<compile_context>
chip_gen: v5e
topology: v5e:2x2
jax: 0.10.0
libtpu: 0.0.40
codegen_flags: <defaults>
</compile_context>

<pallas_src>
import jax
import jax.numpy as jnp
from jax.experimental import pallas as pl
from jax.experimental.pallas import tpu as pltpu


def _round_up(x, m):
    return ((x + m - 1) // m) * m


def _vmem_capacity_bytes():
    """Best-effort query of per-core VMEM capacity; conservative fallback."""
    try:
        info = pltpu.get_tpu_info()
        for name in ("vmem_capacity_bytes", "vmem_size_bytes", "vmem_bytes"):
            cap = getattr(info, name, None)
            if cap:
                return int(cap)
    except Exception:
        pass
    return 64 * (1 << 20)  # v7x physical VMEM -- safe on every generation


def _ffn_kernel(x_ref, w1t_ref, b1_ref, w2t_ref, b2_ref, o_ref):
    # x_ref:  (tm, H)  f32 token tile
    # w1t_ref:(H, Hp)  bf16 resident W1^T (output lanes zero-padded to Hp)
    # b1_ref: (1, Hp)  f32 bias (zero-padded)
    # w2t_ref:(Hp, H)  bf16 resident W2^T (input rows zero-padded to Hp)
    # b2_ref: (1, H)   f32 bias
    # o_ref:  (tm, H)  f32 output tile
    xb = x_ref[...].astype(w1t_ref.dtype)                    # bf16 MXU operand
    h = jnp.dot(xb, w1t_ref[...],
                preferred_element_type=jnp.float32) + b1_ref[...]
    h = jnp.maximum(h, 0.0)                                   # ReLU in f32 (VPU)
    y = jnp.dot(h.astype(w2t_ref.dtype), w2t_ref[...],
                preferred_element_type=jnp.float32) + b2_ref[...]
    # Re-read the (already VMEM-resident) x tile for the residual instead of
    # keeping a (tm, H) f32 value live across both matmuls.
    o_ref[...] = (y + x_ref[...]).astype(o_ref.dtype)


def prepare_ffn_params(w1, b1, w2, b2):
    """One-time (init-time) weight preprocessing; zero per-call cost.

    w1, w2: (H, H) Conv1d(kernel_size=1) weights (out, in) with the size-1
    kernel axis squeezed.  b1, b2: (H,).
    """
    H = w1.shape[0]
    Hp = _round_up(H, 128)                  # lane-dense intermediate (hidden) dim
    w1t = jnp.zeros((H, Hp), jnp.bfloat16).at[:, :H].set(w1.T.astype(jnp.bfloat16))
    b1r = jnp.zeros((1, Hp), jnp.float32).at[:, :H].set(b1.astype(jnp.float32))
    w2t = jnp.zeros((Hp, H), jnp.bfloat16).at[:H, :].set(w2.T.astype(jnp.bfloat16))
    b2r = b2.astype(jnp.float32).reshape(1, H)
    return w1t, b1r, w2t, b2r


def pointwise_feedforward(x, w1t, b1r, w2t, b2r, *, tm_target=1024):
    """x: (B, L, H) float32. Weights must come from prepare_ffn_params()."""
    B, L, H = x.shape
    Hp = w1t.shape[1]
    N = B * L
    x2d = x.reshape(N, H)                   # metadata-only, no HBM copy

    # ---- pick the token tile -----------------------------------------------
    cap = _vmem_capacity_bytes()
    work_budget = int(cap * 0.6)            # leave headroom for compiler temps

    def _vmem_bytes(tm_):
        io = 2 * 2 * tm_ * H * 4              # double-buffered f32 x + out tiles
        wts = 2 * H * Hp * 2 + (Hp + H) * 4   # single-buffered bf16 weights + biases
        tmp = 2 * tm_ * Hp * 4                # in-kernel h / y f32 temporaries
        return io + wts + tmp

    if N <= 8:
        tm = N                              # single tiny full-extent tile
    else:
        tm = min(tm_target, _round_up(N, 8))
        while tm > 128 and _vmem_bytes(tm) > work_budget:
            tm //= 2
        # v7x megacore: make sure the ("parallel",) axis has >= 2 tiles so both
        # TensorCores get work (harmless on single-TC chips).
        if pl.cdiv(N, tm) == 1:
            tm = max(8, _round_up((N + 1) // 2, 8))

    grid = (pl.cdiv(N, tm),)                # ragged last block; no token padding

    vmem_limit = int(min(max(2 * _vmem_bytes(tm), 32 * (1 << 20)),
                         (cap * 3) // 4))

    cost = pl.CostEstimate(
        flops=4 * N * H * Hp,               # two matmuls per token
        transcendentals=0,
        bytes_accessed=2 * H * Hp * 2       # bf16 weights (read once)
        + 2 * N * H * 4                     # f32 x in + out
        + (Hp + H) * 4,                     # biases
    )

    out2d = pl.pallas_call(
        _ffn_kernel,
        out_shape=jax.ShapeDtypeStruct((N, H), x.dtype),
        grid_spec=pltpu.PrefetchScalarGridSpec(
            num_scalar_prefetch=0,
            grid=grid,
            in_specs=[
                pl.BlockSpec((tm, H), lambda i: (i, 0)),        # token tile
                pl.BlockSpec((H, Hp), lambda i: (0, 0),
                             pipeline_mode=pl.Buffered(1)),     # W1^T (resident)
                pl.BlockSpec((1, Hp), lambda i: (0, 0),
                             pipeline_mode=pl.Buffered(1)),     # b1
                pl.BlockSpec((Hp, H), lambda i: (0, 0),
                             pipeline_mode=pl.Buffered(1)),     # W2^T (resident)
                pl.BlockSpec((1, H), lambda i: (0, 0),
                             pipeline_mode=pl.Buffered(1)),     # b2
            ],
            out_specs=pl.BlockSpec((tm, H), lambda i: (i, 0)),
        ),
        compiler_params=pltpu.CompilerParams(
            dimension_semantics=("parallel",),
            vmem_limit_bytes=vmem_limit,
        ),
        cost_estimate=cost,
    )(x2d, w1t, b1r, w2t, b2r)

    return out2d.reshape(B, L, H)


def _reference(x, w1, b1, w2, b2):
    # Pure-JAX f32 reference of the PyTorch forward (eval mode).
    h = jnp.einsum("blh,oh->blo", x, w1) + b1
    h = jnp.maximum(h, 0.0)
    y = jnp.einsum("blh,oh->blo", h, w2) + b2
    return y + x


if __name__ == "__main__":
    B, L, H = 2, 8, 32          # batch, seq, hidden_units
    key = jax.random.PRNGKey(0)
    kx, k1, k2, k3, k4 = jax.random.split(key, 5)

    x = jax.random.normal(kx, (B, L, H), dtype=jnp.float32)
    # Deterministic "Conv1d(hidden, hidden, kernel_size=1)" parameters
    # (pre-squeezed to (out, in); a raw PyTorch weight would be (out, in, 1)).
    w1 = jax.random.normal(k1, (H, H), dtype=jnp.float32) * 0.1
    b1 = jax.random.normal(k2, (H,), dtype=jnp.float32) * 0.1
    w2 = jax.random.normal(k3, (H, H), dtype=jnp.float32) * 0.1
    b2 = jax.random.normal(k4, (H,), dtype=jnp.float32) * 0.1

    # One-time weight prep (would live at model init, not in the forward path).
    params = prepare_ffn_params(w1, b1, w2, b2)

    out = pointwise_feedforward(x, *params)
    out = jax.block_until_ready(out)

    ref = _reference(x, w1, b1, w2, b2)
    assert out.shape == ref.shape
    # Tolerance loosened for bf16 MXU operands (f32 accumulation + f32 residual).
    assert jnp.allclose(out, ref, atol=2e-2, rtol=2e-2), "mismatch vs reference"

    print("KERNEL_OK")
</pallas_src>

<mosaic_0001>
module attributes {stable_mosaic.version = 11 : i64} {
  func.func @_ffn_kernel(%arg0: i32, %arg1: memref<8x32xf32, #tpu.memory_space<vmem>>, %arg2: memref<32x128xbf16, #tpu.memory_space<vmem>>, %arg3: memref<1x128xf32, #tpu.memory_space<vmem>>, %arg4: memref<128x32xbf16, #tpu.memory_space<vmem>>, %arg5: memref<1x32xf32, #tpu.memory_space<vmem>>, %arg6: memref<8x32xf32, #tpu.memory_space<vmem>>) attributes {dimension_semantics = [#tpu.dimension_semantics<parallel>], iteration_bounds = array<i64: 2>, scalar_prefetch = 0 : i64, scratch_operands = 0 : i64, tpu.core_type = #tpu.core_type<tc>, window_params = [{transform_indices = @transform_0, window_bounds = array<i64: 8, 32>}, {pipeline_mode = #tpu.pipeline_mode<synchronous>, transform_indices = @transform_1, window_bounds = array<i64: 32, 128>}, {pipeline_mode = #tpu.pipeline_mode<synchronous>, transform_indices = @transform_2, window_bounds = array<i64: 1, 128>}, {pipeline_mode = #tpu.pipeline_mode<synchronous>, transform_indices = @transform_3, window_bounds = array<i64: 128, 32>}, {pipeline_mode = #tpu.pipeline_mode<synchronous>, transform_indices = @transform_4, window_bounds = array<i64: 1, 32>}, {transform_indices = @transform_5, window_bounds = array<i64: 8, 32>}]} {
    %c0 = arith.constant 0 : index
    %c0_0 = arith.constant 0 : index
    %0 = vector.load %arg1[%c0, %c0_0] : memref<8x32xf32, #tpu.memory_space<vmem>>, vector<8x32xf32>
    %1 = arith.truncf %0 : vector<8x32xf32> to vector<8x32xbf16>
    %c0_1 = arith.constant 0 : index
    %c0_2 = arith.constant 0 : index
    %2 = vector.load %arg2[%c0_1, %c0_2] : memref<32x128xbf16, #tpu.memory_space<vmem>>, vector<32x128xbf16>
    %cst = arith.constant dense<0.000000e+00> : vector<8x128xf32>
    %3 = tpu.matmul %1, %2, %cst {dimension_numbers = #tpu.dot_dimension_numbers<[1], [0], [0], [1], [0, 0, 1, 1], [], []>} : vector<8x32xbf16>, vector<32x128xbf16>, vector<8x128xf32> -> vector<8x128xf32>
    %c0_3 = arith.constant 0 : index
    %c0_4 = arith.constant 0 : index
    %4 = vector.load %arg3[%c0_3, %c0_4] : memref<1x128xf32, #tpu.memory_space<vmem>>, vector<1x128xf32>
    %5 = vector.broadcast %4 : vector<1x128xf32> to vector<8x128xf32>
    %6 = arith.addf %3, %5 : vector<8x128xf32>
    %cst_5 = arith.constant 0.000000e+00 : f32
    %7 = vector.broadcast %cst_5 : f32 to vector<8x128xf32>
    %8 = arith.maximumf %6, %7 : vector<8x128xf32>
    %9 = arith.truncf %8 : vector<8x128xf32> to vector<8x128xbf16>
    %c0_6 = arith.constant 0 : index
    %c0_7 = arith.constant 0 : index
    %10 = vector.load %arg4[%c0_6, %c0_7] : memref<128x32xbf16, #tpu.memory_space<vmem>>, vector<128x32xbf16>
    %cst_8 = arith.constant dense<0.000000e+00> : vector<8x32xf32>
    %11 = tpu.matmul %9, %10, %cst_8 {dimension_numbers = #tpu.dot_dimension_numbers<[1], [0], [0], [1], [0, 0, 1, 1], [], []>} : vector<8x128xbf16>, vector<128x32xbf16>, vector<8x32xf32> -> vector<8x32xf32>
    %c0_9 = arith.constant 0 : index
    %c0_10 = arith.constant 0 : index
    %12 = vector.load %arg5[%c0_9, %c0_10] : memref<1x32xf32, #tpu.memory_space<vmem>>, vector<1x32xf32>
    %13 = vector.broadcast %12 : vector<1x32xf32> to vector<8x32xf32>
    %14 = arith.addf %11, %13 : vector<8x32xf32>
    %c0_11 = arith.constant 0 : index
    %c0_12 = arith.constant 0 : index
    %15 = vector.load %arg1[%c0_11, %c0_12] : memref<8x32xf32, #tpu.memory_space<vmem>>, vector<8x32xf32>
    %16 = arith.addf %14, %15 : vector<8x32xf32>
    %c0_13 = arith.constant 0 : index
    %c0_14 = arith.constant 0 : index
    %17 = vector.load %arg6[%c0_13, %c0_14] : memref<8x32xf32, #tpu.memory_space<vmem>>, vector<8x32xf32>
    tpu.vector_store %arg6[%c0_13, %c0_14], %16 {strides = array<i32>} : memref<8x32xf32, #tpu.memory_space<vmem>>, vector<8x32xf32>,
    return
  }
  func.func @transform_0(%arg0: i32) -> (i32, i32) {
    %c0_i32 = arith.constant 0 : i32
    %c0_i32_0 = arith.constant 0 : i32
    return %arg0, %c0_i32 : i32, i32
  }
  func.func @transform_1(%arg0: i32) -> (i32, i32) {
    %c0_i32 = arith.constant 0 : i32
    %c0_i32_0 = arith.constant 0 : i32
    %c0_i32_1 = arith.constant 0 : i32
    return %c0_i32, %c0_i32_0 : i32, i32
  }
  func.func @transform_2(%arg0: i32) -> (i32, i32) {
    %c0_i32 = arith.constant 0 : i32
    %c0_i32_0 = arith.constant 0 : i32
    %c0_i32_1 = arith.constant 0 : i32
    return %c0_i32, %c0_i32_0 : i32, i32
  }
  func.func @transform_3(%arg0: i32) -> (i32, i32) {
    %c0_i32 = arith.constant 0 : i32
    %c0_i32_0 = arith.constant 0 : i32
    %c0_i32_1 = arith.constant 0 : i32
    return %c0_i32, %c0_i32_0 : i32, i32
  }
  func.func @transform_4(%arg0: i32) -> (i32, i32) {
    %c0_i32 = arith.constant 0 : i32
    %c0_i32_0 = arith.constant 0 : i32
    %c0_i32_1 = arith.constant 0 : i32
    return %c0_i32, %c0_i32_0 : i32, i32
  }
  func.func @transform_5(%arg0: i32) -> (i32, i32) {
    %c0_i32 = arith.constant 0 : i32
    %c0_i32_0 = arith.constant 0 : i32
    return %arg0, %c0_i32 : i32, i32
  }
}

</mosaic_0001>

<bundles_post_ra>
// kernel: tpu_custom_call.1
= control target key start
LH: loop header
LB: loop body
LE: loop exit
PB: predicated region body
PF: predicated region fallthrough
CT: control target
= control target key end

     0   :  { %10 = vsyncpa [#allocation3], 0  ;;  %s739_s0 = inlined_call_operand.vmem [shape: f32[16,32], index: 0, kind: input, shape index: {}]   ;;  %s740_s1 = inlined_call_operand.vmem [shape: bf16[32,128], index: 1, kind: input, shape index: {}]   ;;  %s741_s2 = inlined_call_operand.vmem [shape: f32[1,128], index: 2, kind: input, shape index: {}]   ;;  %s742_s3 = inlined_call_operand.vmem [shape: bf16[128,32], index: 3, kind: input, shape index: {}]   ;;  %s743_s4 = inlined_call_operand.vmem [shape: f32[1,32], index: 4, kind: input, shape index: {}]   ;;  %s744_s5 = inlined_call_operand.hbm [shape: f32[16,32], index: 5, kind: output, shape index: {}]  }
   0x1   :  { %12 = vsyncpa [#allocation3 + $0x1], 0  ;;  %s616_s18 = smov 0   ;;  %s618_s19 = smov 0  }
   0x2   :  { %s620_s20 = smov 0   ;;  %s622_s21 = smov 0  }
   0x3 LB: > { %s637_s22 = sadd.s32 4294967295, %s584_s21   ;;  %s420_s23 = sadd.s32 4294967294, %s584_s21   ;;  %s584_s21 = sphi %s622_s21, %s750_s21   ;;  %s580_s20 = sphi %s620_s20, %s749_s20   ;;  %s576_s19 = sphi %s618_s19, %s748_s19   ;;  %s572_s18 = sphi %s616_s18, %s747_s18  }
   0x4   : > { %s641_s24 = sadd.s32 1, %s584_s21   ;;  %s135_s25 = sadd.s32 1, %s580_s20 }
   0x5   : > { %s132_s26 = ssub.s32 %s584_s21, %s641_s24  ;;  %p145_p0 = scmp.ne.s32.totalorder %s580_s20, %s576_s19 }
   0x6   : > { %p133_p1 = scmp.eq.s32.totalorder %s132_s26, 0  ;;  %p146_p2 = scmp.eq.s32.totalorder %s637_s22, 1 }
   0x7   : > { %p151_p3 = scmp.ne.s32.totalorder %s576_s19, %s572_s18  ;;  %p152_p4 = scmp.eq.s32.totalorder %s420_s23, 1 }
   0x8   : > { %s652_s27 = scalar_select %p133_p1, %s580_s20, %s135_s25  }
   0x9   : > { %p654_p5 = por %p146_p2, %p145_p0  ;;  %p658_p6 = por %p152_p4, %p151_p3 }
   0xa   : > { %p423_p7 = scmp.ge.s32.totalorder %s584_s21, 1  ;;  %p189_p8 = scmp.lt.s32.totalorder %s584_s21, 3 }
   0xc   : > { %p190_p9 = pnand %p423_p7, %p189_p8 }
   0xd   : > { %p216_p10 = scmp.lt.s32.totalorder (!%p190_p9), %s637_s22, 1  ;;  %s213_s16 = sand.u32 (!%p190_p9), 1, %s576_s19  }
   0xe   : > { %193 = sbr.rel (%p190_p9) target bundleno = 293 (0x125), region = 40  ;;  %s468_s23 = sshll.u32 (!%p190_p9), %s637_s22, 3 }
   0xf   : > { %s356_s7 = scalar_lea.hbm (!%p190_p9), %s744_s5, %s468_s23  ;;  %s542_s15 = scalar_lea.hbm (!%p190_p9), %s744_s5, 16 }
  0x10   : > { %s360_s10 = sshll.u32 (!%p190_p9), %s356_s7, 4  ;;  %s361_s10 = int_to_ptr.hbm [resolvable:$true] %s360_s10 }
  0x13   : > { %v472_v0 = vld [vmem:[%s740_s1 + $0x8] sm:$0xff]  ;;  %v480_v1 = vld [vmem:[%s742_s3 + $0x38] sm:$0xff]  ;;  %v471_v2 = vld [vmem:[%s740_s1] sm:$0xff]  ;;  %s217_s11 = scalar_select %p216_p10, %s637_s22, 1  ;;  %vm243_vm0 = vcmask 261120  }
  0x14   : > { %253 = vmatpush.bf16.msra.mxu0 %v472_v0  ;;  %330 = vmatpush.bf16.msra.mxu1 %v480_v1  ;;  %v479_v3 = vld [vmem:[%s742_s3 + $0x30] sm:$0xff]  ;;  %v478_v5 = vld [vmem:[%s742_s3 + $0x28] sm:$0xff]  ;;  %v477_v7 = vld [vmem:[%s742_s3 + $0x20] sm:$0xff]  ;;  %s346_s22 = scalar_lea.sflag [#allocation3], %s213_s16 }
  0x15   : > { %s425_s14 = sshll.u32 %s217_s11, 3  ;;  %v476_v8 = vld [vmem:[%s742_s3 + $0x18] sm:$0xff]  ;;  %v475_v9 = vld [vmem:[%s742_s3 + $0x10] sm:$0xff]  ;;  %v474_v10 = vld [vmem:[%s742_s3 + $0x8] sm:$0xff]  ;;  %s536_s11 = sshra.s32 %s361_s10, 4  ;;  %s537_s11 = int_to_ptr.hbm [resolvable:$true] %s536_s11 }
  0x16   : > { %s219_s17 = scalar_lea.vmem %s739_s0, %s425_s14  ;;  %v473_v11 = vld [vmem:[%s742_s3] sm:$0xff]  ;;  %s538_s12 = scalar_lea.hbm %s537_s11, 8 }
  0x17   : > { %v221_v4 = vld [vmem:[%s219_s17] sm:$0xff]  ;;  %s424_s17 = sshll.u32 %s213_s16, 3  ;;  %p539_p11 = scmp.ne.s32.totalorder %s537_s11, %s538_s12 }
  0x18   : > { %254 = vmatpush.bf16.msra.mxu0 %v471_v2  ;;  %331 = vmatpush.bf16.msra.mxu1 %v479_v3  ;;  %v222_v6 = vpack.c.bf16 %v221_v4, %v221_v4  ;;  %v520_v12 = vld [vmem:[%s741_s2] ss:$0 sm:$0xff]  ;;  %s215_s8 = scalar_lea.vmem [#allocation2], %s424_s17  ;;  %p543_p0 = scmp.lt.s32.totalorder %s537_s11, %s744_s5 }
  0x19   : > { %v521_v18 = vld [vmem:[%s743_s4] ss:$0 sm:$0xff]  ;;  %s358_s9 = sshll.u32 %s215_s8, 4  ;;  %p540_p12 = pnand %p539_p11, %p654_p5  ;;  %s359_s9 = int_to_ptr.vmem [resolvable:$true] %s358_s9 }
  0x1a   : > { %p544_p1 = scmp.lt.s32.totalorder %s542_s15, %s538_s12 }
  0x1b   : > { %434 = vmatmul.msk.bf16.vlgmr.msra.gmra.mxu0 %vm243_vm0, %v222_v6  ;;  %p541_p13 = pneg %p540_p12 }
  0x1c   : > { %332 = vmatpush.bf16.msra.mxu1 %v478_v5  ;;  %p545_p2 = por %p544_p1, %p543_p0 }
  0x1e   : > { %p546_p3 = pnand %p545_p2, %p541_p13 }
  0x20   : > { %333 = vmatpush.bf16.msra.mxu1 %v477_v7 }
  0x24   : > { %334 = vmatpush.bf16.msra.mxu1 %v476_v8 }
  0x28   : > { %335 = vmatpush.bf16.msra.mxu1 %v475_v9 }
  0x2c   : > { %336 = vmatpush.bf16.msra.mxu1 %v474_v10 }
  0x30   : > { %337 = vmatpush.bf16.msra.mxu1 %v473_v11 }
  0x98   : > { %v256_v13 = vpop.f32.mrf.mxu0 }
  0x99   : > { %v257_v14 = vadd.f32 %v520_v12, %v256_v13 }
  0x9b   : > { %v260_v15 = vmax.f32 %v257_v14, 0.0 }
  0x9d   : > { %v261_v16 = vpack.c.bf16 %v260_v15, %v260_v15 }
  0x9f   : > { %338 = vmatmul.bf16.vlgmr.msra.gmra.mxu1 %v261_v16 }
  0xa0   : > { %v258_v17 = vpop.f32.mrf.mxu0 }
 0x11c   : > { %v339_v19 = vpop.f32.mrf.mxu1 }
 0x11d   : > { %v340_v20 = vadd.f32 %v521_v18, %v339_v19 }
 0x11f   : > { %v343_v21 = vadd.f32 %v340_v20, %v221_v4 }
 0x121   : > { %344 = vst.msk [vmem:[%s215_s8] sm:$0xff] %vm243_vm0, %v343_v21 }
 0x122   : > { %549 = shalt.err (!%p546_p3)
}
 0x123   : > { %481 = dma.vmem_to_hbm [thread:$0]  (%p654_p5), %s359_s9, 128, %s361_s10, %s346_s22  }
 0x124   : > { %v341_v22 = vpop.f32.mrf.mxu1 }
 0x125 PF: > { %p487_p4 = scmp.ge.s32.totalorder %s584_s21, 2  ;;  %s372_s16 = sand.u32 1, %s572_s18  }
 0x126   : > { %s373_s25 = scalar_lea.sflag [#allocation3], %s372_s16 }
 0x127   : > { %p484_p7 = pnand %p487_p4, %p658_p6 }
 0x129   : > { %p485_p8 = pneg %p484_p7 }
 0x12b   : > { %567 = dma.done.wait (%p485_p8), %s373_s25, 128  }
 0x12c   : > { %569 = vsyncadd (%p485_p8), %s373_s25, 4294967168  ;;  %p15_p9 = scmp.ge.s32.totalorder %s641_s24, 4   ;;  %s747_s18 = smov %s576_s19 }
 0x12d   : > { %s748_s19 = smov %s580_s20  ;;  %s749_s20 = smov %s652_s27 }
 0x12e   : > { %s750_s21 = smov %s641_s24  ;;  %17 = sbr.rel (!%p15_p9) target bundleno = 3 (0x3), region = 75 }
 0x133   :  { %379 = vsyncpa [#allocation3], 1 }
 0x134   :  { %381 = vsyncpa [#allocation3 + $0x1], 1 }

</bundles_post_ra>
